<compile_context>
chip_gen: v5e
topology: v5e:2x2
jax: 0.10.0
libtpu: 0.0.40
codegen_flags: <defaults>
</compile_context>

<pallas_src>
import jax
import jax.numpy as jnp
from jax.experimental import pallas as pl
from jax.experimental.pallas import tpu as pltpu


_EPS = 1e-6
_VMEM_LIMIT_BYTES = 32 * 1024 * 1024     # safe on v5e/v6e/v7x; usage is a few MiB
_FUSED_BUDGET_BYTES = 4 * 1024 * 1024    # per-batch (C, M) f32 slab for fused path
_TILE_BUDGET_BYTES = 2 * 1024 * 1024     # per (C, tile_m) f32 block for tiled path


# ----------------------------------------------------------------------------
# Kernels
# ----------------------------------------------------------------------------

def _grn_fused_kernel(x_ref, gamma_ref, beta_ref, o_ref):
    """Single pass per batch: stats + apply, x touched exactly once."""
    x = x_ref[0]                                               # (C, M) f32
    gx = jnp.sqrt(jnp.sum(x * x, axis=-1, keepdims=True))      # (C, 1) L2 over (H,W)
    inv_c = 1.0 / x.shape[0]
    denom = jnp.sum(gx, axis=0, keepdims=True) * inv_c + _EPS  # (1, 1) mean over C
    scale = gamma_ref[...] * (gx / denom) + 1.0                # (C, 1) = gamma*Nx + 1
    o_ref[0] = x * scale + beta_ref[...]


def _grn_stats_kernel(x_ref, gamma_ref, scale_ref, acc_ref):
    """Pass 1: accumulate sum(x^2) over spatial tiles (grid axis 1 = reduction);
    on the last tile turn it into the fused per-channel scale gamma*Nx + 1."""
    t = pl.program_id(1)

    @pl.when(t == 0)
    def _init():
        acc_ref[...] = jnp.zeros_like(acc_ref)

    x = x_ref[0]                                               # (C, TILE_M) f32
    acc_ref[...] += jnp.sum(x * x, axis=-1, keepdims=True)     # (C, 1)

    @pl.when(t == pl.num_programs(1) - 1)
    def _finalize():
        gx = jnp.sqrt(acc_ref[...])                            # (C, 1)
        inv_c = 1.0 / acc_ref.shape[0]
        denom = jnp.sum(gx, axis=0, keepdims=True) * inv_c + _EPS
        scale_ref[0] = gamma_ref[...] * (gx / denom) + 1.0     # (C, 1)


def _grn_apply_kernel(x_ref, scale_ref, beta_ref, o_ref):
    """Pass 2: out = x * (gamma*Nx + 1) + beta  ==  gamma*(x*Nx) + beta + x."""
    o_ref[0] = x_ref[0] * scale_ref[0] + beta_ref[...]


# ----------------------------------------------------------------------------
# Wrapper
# ----------------------------------------------------------------------------

def _pick_tile_cols(m, c, bytes_per_block=_TILE_BUDGET_BYTES):
    """Largest lane-dense (multiple-of-128) spatial tile that divides M and keeps
    one f32 (C, TILE_M) block under the byte budget; falls back to full extent."""
    cap = max(128, (bytes_per_block // (c * 4)) // 128 * 128)
    if m <= cap:
        return m
    t = min(cap, (m // 128) * 128)
    while t >= 128:
        if m % t == 0:
            return t
        t -= 128
    return m   # block dim == full array dim is always legal


def grn_forward(x_nchw, gamma, beta, *, block_cols=None):
    """GRN.forward — accepts/returns NCHW (PyTorch layout)."""
    N, C, H, W = x_nchw.shape
    M = H * W
    orig_dtype = x_nchw.dtype

    # Free reshape (contiguous collapse) — no transposes, NCHW-native layout.
    x = x_nchw.reshape(N, C, M).astype(jnp.float32)
    gamma2 = gamma.reshape(C, 1).astype(jnp.float32)
    beta2 = beta.reshape(C, 1).astype(jnp.float32)

    per_batch_bytes = C * M * 4

    if block_cols is None and per_batch_bytes <= _FUSED_BUDGET_BYTES:
        # ---- fused single-pass path: x read once, out written once ----------
        out = pl.pallas_call(
            _grn_fused_kernel,
            grid=(N,),
            in_specs=[
                pl.BlockSpec((1, C, M), lambda n: (n, 0, 0)),     # x (per batch)
                pl.BlockSpec((C, 1), lambda n: (0, 0)),           # gamma (invariant)
                pl.BlockSpec((C, 1), lambda n: (0, 0)),           # beta  (invariant)
            ],
            out_specs=pl.BlockSpec((1, C, M), lambda n: (n, 0, 0)),
            out_shape=jax.ShapeDtypeStruct((N, C, M), jnp.float32),
            compiler_params=pltpu.CompilerParams(
                dimension_semantics=("parallel",),
                vmem_limit_bytes=_VMEM_LIMIT_BYTES),
        )(x, gamma2, beta2)
    else:
        # ---- two-pass path for large (C, M) slabs ----------------------------
        tile_m = block_cols if block_cols is not None else _pick_tile_cols(M, C)
        assert M % tile_m == 0, (M, tile_m)
        n_tiles = M // tile_m

        # pass 1: per-(batch, channel) reduction -> fused scale (gamma*Nx + 1)
        scale = pl.pallas_call(
            _grn_stats_kernel,
            grid=(N, n_tiles),
            in_specs=[
                pl.BlockSpec((1, C, tile_m), lambda n, t: (n, 0, t)),   # x tile
                pl.BlockSpec((C, 1), lambda n, t: (0, 0)),              # gamma
            ],
            out_specs=pl.BlockSpec((1, C, 1), lambda n, t: (n, 0, 0)),  # accumulator-style
            out_shape=jax.ShapeDtypeStruct((N, C, 1), jnp.float32),
            scratch_shapes=[pltpu.VMEM((C, 1), jnp.float32)],
            compiler_params=pltpu.CompilerParams(
                dimension_semantics=("parallel", "arbitrary"),
                vmem_limit_bytes=_VMEM_LIMIT_BYTES),
        )(x, gamma2)

        # pass 2: elementwise apply (fully parallel, megacore-shardable)
        out = pl.pallas_call(
            _grn_apply_kernel,
            grid=(N, n_tiles),
            in_specs=[
                pl.BlockSpec((1, C, tile_m), lambda n, t: (n, 0, t)),   # x tile
                pl.BlockSpec((1, C, 1), lambda n, t: (n, 0, 0)),        # scale (per batch)
                pl.BlockSpec((C, 1), lambda n, t: (0, 0)),              # beta
            ],
            out_specs=pl.BlockSpec((1, C, tile_m), lambda n, t: (n, 0, t)),
            out_shape=jax.ShapeDtypeStruct((N, C, M), jnp.float32),
            compiler_params=pltpu.CompilerParams(
                dimension_semantics=("parallel", "parallel"),
                vmem_limit_bytes=_VMEM_LIMIT_BYTES),
        )(x, scale, beta2)

    return out.reshape(N, C, H, W).astype(orig_dtype)


# ----------------------------------------------------------------------------
# Pure-JAX reference (correctness check)
# ----------------------------------------------------------------------------

def grn_reference(x_nchw, gamma, beta, eps=_EPS):
    xf = x_nchw.astype(jnp.float32)
    gx = jnp.sqrt(jnp.sum(xf * xf, axis=(2, 3), keepdims=True))       # (N,C,1,1) L2 over H,W
    nx = gx / (jnp.mean(gx, axis=1, keepdims=True) + eps)             # mean over channels
    g = gamma.reshape(1, -1, 1, 1)
    b = beta.reshape(1, -1, 1, 1)
    return (g * (xf * nx) + b + xf).astype(x_nchw.dtype)


# ----------------------------------------------------------------------------

if __name__ == "__main__":
    key = jax.random.PRNGKey(0)

    # (N, C, H, W, forced spatial tile).  The last config forces a spatial tile
    # so the two-pass reduction/accumulator path is exercised as well.
    configs = [(2, 4, 16, 16, None),      # small spec-sized shape, fused path
               (2, 128, 16, 16, None),    # fused path, lane-dense spatial axis
               (2, 32, 16, 16, 128)]      # forced tiling -> two-pass path

    for (N, C, H, W, tile_cols) in configs:
        key, kx, kg, kb = jax.random.split(key, 4)
        x = jax.random.normal(kx, (N, C, H, W), jnp.float32)
        # NOTE: the PyTorch module initializes gamma/beta to zeros (identity map);
        # randomize here so the normalization math is actually exercised.
        gamma = 0.5 * jax.random.normal(kg, (C,), jnp.float32)
        beta = 0.5 * jax.random.normal(kb, (C,), jnp.float32)

        out = jax.block_until_ready(grn_forward(x, gamma, beta, block_cols=tile_cols))
        ref = jax.block_until_ready(grn_reference(x, gamma, beta))

        assert out.shape == (N, C, H, W), out.shape
        assert jnp.allclose(out, ref, rtol=1e-4, atol=1e-4), \
            float(jnp.max(jnp.abs(out - ref)))

    print("KERNEL_OK")
</pallas_src>

<mosaic_0001>
module attributes {stable_mosaic.version = 11 : i64} {
  func.func @_grn_fused_kernel(%arg0: i32, %arg1: memref<1x4x256xf32, #tpu.memory_space<vmem>>, %arg2: memref<4x1xf32, #tpu.memory_space<vmem>>, %arg3: memref<4x1xf32, #tpu.memory_space<vmem>>, %arg4: memref<1x4x256xf32, #tpu.memory_space<vmem>>) attributes {dimension_semantics = [#tpu.dimension_semantics<parallel>], iteration_bounds = array<i64: 2>, scalar_prefetch = 0 : i64, scratch_operands = 0 : i64, tpu.core_type = #tpu.core_type<tc>, window_params = [{transform_indices = @transform_0, window_bounds = array<i64: 1, 4, 256>}, {pipeline_mode = #tpu.pipeline_mode<synchronous>, transform_indices = @transform_1, window_bounds = array<i64: 4, 1>}, {pipeline_mode = #tpu.pipeline_mode<synchronous>, transform_indices = @transform_2, window_bounds = array<i64: 4, 1>}, {transform_indices = @transform_3, window_bounds = array<i64: 1, 4, 256>}]} {
    %c0 = arith.constant 0 : index
    %c0_0 = arith.constant 0 : index
    %c0_1 = arith.constant 0 : index
    %0 = vector.load %arg1[%c0, %c0_0, %c0_1] : memref<1x4x256xf32, #tpu.memory_space<vmem>>, vector<1x4x256xf32>
    %1 = vector.shape_cast %0 : vector<1x4x256xf32> to vector<4x256xf32>
    %2 = arith.mulf %1, %1 : vector<4x256xf32>
    %cst = arith.constant dense<0.000000e+00> : vector<4xf32>
    %3 = vector.multi_reduction <add>, %2, %cst [1] : vector<4x256xf32> to vector<4xf32>
    %4 = vector.shape_cast %3 : vector<4xf32> to vector<4x1xf32>
    %5 = math.sqrt %4 : vector<4x1xf32>
    %cst_2 = arith.constant dense<0.000000e+00> : vector<1xf32>
    %6 = vector.multi_reduction <add>, %5, %cst_2 [0] : vector<4x1xf32> to vector<1xf32>
    %7 = vector.shape_cast %6 : vector<1xf32> to vector<1x1xf32>
    %cst_3 = arith.constant 2.500000e-01 : f32
    %8 = vector.broadcast %cst_3 : f32 to vector<1x1xf32>
    %9 = arith.mulf %7, %8 : vector<1x1xf32>
    %cst_4 = arith.constant 9.99999997E-7 : f32
    %10 = vector.broadcast %cst_4 : f32 to vector<1x1xf32>
    %11 = arith.addf %9, %10 : vector<1x1xf32>
    %c0_5 = arith.constant 0 : index
    %c0_6 = arith.constant 0 : index
    %12 = vector.load %arg2[%c0_5, %c0_6] : memref<4x1xf32, #tpu.memory_space<vmem>>, vector<4x1xf32>
    %13 = vector.broadcast %11 : vector<1x1xf32> to vector<4x1xf32>
    %14 = arith.divf %5, %13 : vector<4x1xf32>
    %15 = arith.mulf %12, %14 : vector<4x1xf32>
    %cst_7 = arith.constant 1.000000e+00 : f32
    %16 = vector.broadcast %cst_7 : f32 to vector<4x1xf32>
    %17 = arith.addf %15, %16 : vector<4x1xf32>
    %18 = vector.broadcast %17 : vector<4x1xf32> to vector<4x256xf32>
    %19 = arith.mulf %1, %18 : vector<4x256xf32>
    %c0_8 = arith.constant 0 : index
    %c0_9 = arith.constant 0 : index
    %20 = vector.load %arg3[%c0_8, %c0_9] : memref<4x1xf32, #tpu.memory_space<vmem>>, vector<4x1xf32>
    %21 = vector.broadcast %20 : vector<4x1xf32> to vector<4x256xf32>
    %22 = arith.addf %19, %21 : vector<4x256xf32>
    %c0_10 = arith.constant 0 : index
    %c0_11 = arith.constant 0 : index
    %c0_12 = arith.constant 0 : index
    %23 = vector.load %arg4[%c0_10, %c0_11, %c0_12] : memref<1x4x256xf32, #tpu.memory_space<vmem>>, vector<1x4x256xf32>
    %24 = vector.shape_cast %23 : vector<1x4x256xf32> to vector<4x256xf32>
    %25 = vector.shape_cast %22 : vector<4x256xf32> to vector<1x4x256xf32>
    tpu.vector_store %arg4[%c0_10, %c0_11, %c0_12], %25 {strides = array<i32>} : memref<1x4x256xf32, #tpu.memory_space<vmem>>, vector<1x4x256xf32>,
    return
  }
  func.func @transform_0(%arg0: i32) -> (i32, i32, i32) {
    %c0_i32 = arith.constant 0 : i32
    %c0_i32_0 = arith.constant 0 : i32
    %c0_i32_1 = arith.constant 0 : i32
    return %arg0, %c0_i32, %c0_i32_0 : i32, i32, i32
  }
  func.func @transform_1(%arg0: i32) -> (i32, i32) {
    %c0_i32 = arith.constant 0 : i32
    %c0_i32_0 = arith.constant 0 : i32
    %c0_i32_1 = arith.constant 0 : i32
    return %c0_i32, %c0_i32_0 : i32, i32
  }
  func.func @transform_2(%arg0: i32) -> (i32, i32) {
    %c0_i32 = arith.constant 0 : i32
    %c0_i32_0 = arith.constant 0 : i32
    %c0_i32_1 = arith.constant 0 : i32
    return %c0_i32, %c0_i32_0 : i32, i32
  }
  func.func @transform_3(%arg0: i32) -> (i32, i32, i32) {
    %c0_i32 = arith.constant 0 : i32
    %c0_i32_0 = arith.constant 0 : i32
    %c0_i32_1 = arith.constant 0 : i32
    return %arg0, %c0_i32, %c0_i32_0 : i32, i32, i32
  }
}

</mosaic_0001>

<bundles_post_ra>
// kernel: tpu_custom_call.1
= control target key start
LH: loop header
LB: loop body
LE: loop exit
PB: predicated region body
PF: predicated region fallthrough
CT: control target
= control target key end

     0   :  { %8 = vsyncpa [#allocation3], 0  ;;  %s686_s0 = inlined_call_operand.hbm [shape: f32[2,4,256], index: 0, kind: input, shape index: {}]   ;;  %s687_s1 = inlined_call_operand.vmem [shape: f32[4,1], index: 1, kind: input, shape index: {}]   ;;  %s688_s2 = inlined_call_operand.vmem [shape: f32[4,1], index: 2, kind: input, shape index: {}]   ;;  %s689_s3 = inlined_call_operand.hbm [shape: f32[2,4,256], index: 3, kind: output, shape index: {}]  }
   0x1   :  { %10 = vsyncpa [#allocation3 + $0x1], 0 }
   0x2   :  { %11 = vsyncpa [#allocation4], 0 }
   0x3   :  { %13 = vsyncpa [#allocation4 + $0x1], 0  ;;  %s541_s12 = smov 0   ;;  %s543_s13 = smov 0  }
   0x4   :  { %s545_s14 = smov 0   ;;  %s547_s15 = smov 0  }
   0x5 LB: > { %s562_s16 = sadd.s32 4294967295, %s517_s15   ;;  %s351_s17 = sadd.s32 4294967294, %s517_s15   ;;  %s517_s15 = sphi %s547_s15, %s699_s15   ;;  %s513_s14 = sphi %s545_s14, %s698_s14   ;;  %s509_s13 = sphi %s543_s13, %s697_s13   ;;  %s505_s12 = sphi %s541_s12, %s696_s12  }
   0x6   : > { %s566_s18 = sadd.s32 1, %s517_s15   ;;  %s26_s19 = sadd.s32 1, %s513_s14 }
   0x7   : > { %s23_s20 = ssub.s32 %s517_s15, %s566_s18  ;;  %p33_p0 = scmp.ne.s32.totalorder %s513_s14, %s509_s13 }
   0x8   : > { %p24_p1 = scmp.eq.s32.totalorder %s23_s20, 0  ;;  %p34_p2 = scmp.eq.s32.totalorder %s517_s15, 0 }
   0x9   : > { %p39_p3 = scmp.ne.s32.totalorder %s509_s13, %s505_s12  ;;  %p40_p4 = scmp.eq.s32.totalorder %s562_s16, 0 }
   0xa   : > { %s578_s21 = scalar_select %p24_p1, %s513_s14, %s26_s19  }
   0xb   : > { %p580_p5 = por %p34_p2, %p33_p0  ;;  %p584_p6 = por %p40_p4, %p39_p3 }
   0xc   : > { %p105_p7 = scmp.eq.s32.totalorder %s562_s16, 1  ;;  %p111_p8 = scmp.eq.s32.totalorder %s351_s17, 1 }
   0xd   : > { %p379_p10 = scmp.lt.s32.totalorder %s517_s15, 2  ;;  %s137_s26 = sand.u32 1, %s513_s14  }
   0xe   : > { %p591_p11 = por %p105_p7, %p33_p0  ;;  %p595_p12 = por %p111_p8, %p39_p3 }
   0xf   : > { %s365_s27 = sshll.u32 %s517_s15, 3  ;;  %s354_s28 = sshll.u32 %s137_s26, 3 }
  0x10   : > { %s146_s4 = scalar_lea.hbm %s686_s0, %s365_s27  ;;  %s141_s6 = scalar_lea.vmem [#allocation2], %s354_s28 }
  0x11   : > { %s148_s5 = sshll.u32 %s146_s4, 4  ;;  %s150_s7 = sshll.u32 %s141_s6, 4  ;;  %s149_s5 = int_to_ptr.hbm [resolvable:$true] %s148_s5  ;;  %s151_s7 = int_to_ptr.vmem [resolvable:$true] %s150_s7 }
  0x12   : > { %p606_p13 = pnand %p379_p10, %p580_p5  ;;  %p357_p0 = scmp.ge.s32.totalorder %s517_s15, 1 }
  0x13   : > { %p155_p1 = scmp.lt.s32.totalorder %s517_s15, 3  ;;  %s138_s9 = scalar_lea.sflag [#allocation3], %s137_s26 }
  0x14   : > { %s421_s10 = sshra.s32 %s149_s5, 4  ;;  %p425_p3 = pneg %p606_p13  ;;  %s422_s10 = int_to_ptr.hbm [resolvable:$true] %s421_s10 }
  0x15   : > { %s423_s11 = scalar_lea.hbm %s422_s10, 8  ;;  %s428_s20 = scalar_lea.hbm %s686_s0, 16 }
  0x16   : > { %p424_p2 = scmp.ne.s32.totalorder %s422_s10, %s423_s11  ;;  %p429_p5 = scmp.lt.s32.totalorder %s422_s10, %s686_s0 }
  0x17   : > { %p430_p8 = scmp.lt.s32.totalorder %s428_s20, %s423_s11 }
  0x18   : > { %p426_p4 = pnand %p425_p3, %p424_p2 }
  0x19   : > { %p431_p10 = por %p430_p8, %p429_p5 }
  0x1a   : > { %p427_p7 = pneg %p426_p4 }
  0x1c   : > { %p432_p9 = pnand %p431_p10, %p427_p7 }
  0x1e   : > { %435 = shalt.err (!%p432_p9)
}
  0x1f   : > { %374 = dma.hbm_to_vmem [thread:$0]  (!%p606_p13), %s149_s5, 128, %s151_s7, %s138_s9  }
  0x20   : > { %p156_p2 = pnand %p357_p0, %p155_p1 }
  0x21   : > { %s627_s26 = sand.u32 (!%p156_p2), 1, %s509_s13  }
  0x22   : > { %159 = sbr.rel (%p156_p2) target bundleno = 355 (0x163), region = 32  ;;  %s358_s28 = sshll.u32 (!%p156_p2), %s627_s26, 3 }
  0x23   : > { %s162_s29 = scalar_lea.sflag (!%p156_p2), [#allocation3], %s627_s26  ;;  %s165_s30 = scalar_lea.vmem (!%p156_p2), [#allocation2], %s358_s28 }
  0x27   : > { %496 = dma.done.wait (%p584_p6), %s162_s29, 128  }
  0x28   : > { %498 = vsyncadd (%p584_p6), %s162_s29, 4294967168  ;;  %v637_v0 = vld [vmem:[%s165_s30] sm:$0xff]  ;;  %vm197_vm0 = vcmask 1043456   ;;  %v519_v7 = vmov 0   ;;  %v252_v24 = vld [vmem:[%s688_s2] sm:$0xf] }
  0x29   : > { %v190_v1 = vmul.f32 %v637_v0, %v637_v0  ;;  %415 = vset.pattern.permute.xlu0 %v519_v7  ;;  %416 = vset.pattern.permute.xlu1 %v519_v7  ;;  %v224_v38 = vld [vmem:[%s687_s1] sm:$0xf]  ;;  %v520_v43 = vmov 839922192   ;;  %s366_s7 = sshll.u32 %s562_s16, 3  ;;  %s188_s11 = scalar_lea.vmem [#allocation5], %s358_s28 }
  0x2a   : > { %255 = vperm.xlu1 %416, %v252_v24   ;;  %v247_v44 = vunpack.c.l.s4 %v520_v43  ;;  %s276_s10 = scalar_lea.hbm %s689_s3, %s366_s7  ;;  %s278_s17 = sshll.u32 %s188_s11, 4  ;;  %s279_s17 = int_to_ptr.vmem [resolvable:$true] %s278_s17 }
  0x2b   : > { %192 = vst [vmem:[#allocation1] ss:$2 sm:$0xff] %v190_v1  ;;  %s280_s19 = sshll.u32 %s276_s10, 4  ;;  %s265_s16 = scalar_lea.sflag [#allocation4], %s627_s26  ;;  %s281_s19 = int_to_ptr.hbm [resolvable:$true] %s280_s19 }
  0x2c   : > { %v248_v45 = vunpack.c.0.s8 %v247_v44  ;;  %s465_s20 = sshra.s32 %s281_s19, 4  ;;  %s471_s28 = scalar_lea.hbm %s689_s3, 16  ;;  %s466_s20 = int_to_ptr.hbm [resolvable:$true] %s465_s20 }
  0x2d   : > { %s467_s22 = scalar_lea.hbm %s466_s20, 8  ;;  %p472_p0 = scmp.lt.s32.totalorder %s466_s20, %s689_s3 }
  0x2e   : > { %p468_p6 = scmp.ne.s32.totalorder %s466_s20, %s467_s22  ;;  %p473_p1 = scmp.lt.s32.totalorder %s471_s28, %s467_s22 }
  0x30   : > { %p469_p9 = pnand %p468_p6, %p591_p11  ;;  %p474_p3 = por %p473_p1, %p472_p0 }
  0x32   : > { %v193_v2 = vld.sshfl [vmem:[#allocation1] sm:$0xff pattern:$0x75316420]  ;;  %v194_v3 = vld.sshfl [vmem:[#allocation1 + $0x8] sm:$0xff pattern:$0x75316420]  ;;  %p470_p13 = pneg %p469_p9 }
  0x33   : > { %v198_v4 = vsel %vm197_vm0, %v193_v2, 0.0  ;;  %v199_v5 = vsel %vm197_vm0, %v194_v3, 0.0 }
  0x34   : > { %v200_v6 = vadd.f32 %v199_v5, %v198_v4  ;;  %p475_p4 = pnand %p474_p3, %p470_p13 }
  0x36   : > { %201 = vadd.xlane.f32.xlu0 %v200_v6 }
  0x9c   : > { %v256_v46 = vpop.permute.xlu1 %255 }
  0x9d   : > { %v260_v49 = vperm.slane %v256_v46, %v248_v45 }
  0xa9   : > { %v202_v8 = vpop.xlane.xlu0 %201 }
  0xaa   : > { %417 = vrsqrt.f32 %v202_v8  ;;  %vm210_vm1 = vcmp.eq.f32.partialorder %v202_v8, inf  ;;  %v213_v16 = vand.u32 2147483648, %v202_v8  ;;  %vm212_vm2 = vcmp.eq.f32.partialorder %v202_v8, 0.0 }
  0xb0   : > { %v418_v9 = vpop.eup %417 }
  0xb1   : > { %v204_v10 = vmul.f32 %v418_v9, %v202_v8 }
  0xb3   : > { %v205_v11 = vmul.f32 %v418_v9, %v204_v10 }
  0xb5   : > { %v206_v12 = vmul.f32 0.5, %v205_v11 }
  0xb7   : > { %v207_v13 = vsub.f32 1.5, %v206_v12 }
  0xb9   : > { %v208_v14 = vmul.f32 %v418_v9, %v207_v13 }
  0xbb   : > { %v209_v15 = vmul.f32 %v208_v14, %v202_v8 }
  0xbd   : > { %v211_v17 = vsel %vm210_vm1, %v202_v8, %v209_v15 }
  0xbe   : > { %v214_v18 = vsel %vm212_vm2, %v213_v16, %v211_v17 }
  0xbf   : > { %v215_v19 = vsel %vm197_vm0, %v214_v18, 0.0 }
  0xc0   : > { %v216_v20 = vrot.slane %v215_v19, 4 }
  0xc2   : > { %v217_v21 = vadd.f32 %v216_v20, %v215_v19 }
  0xc4   : > { %v218_v22 = vrot.slane %v217_v21, 2 }
  0xc6   : > { %v219_v23 = vadd.f32 %v218_v22, %v217_v21 }
  0xc8   : > { %v220_v25 = vrot.slane %v219_v23, 1 }
  0xca   : > { %v221_v26 = vadd.f32 %v220_v25, %v219_v23 }
  0xcc   : > { %v222_v27 = vmul.f32 0.25, %v221_v26 }
  0xce   : > { %v223_v28 = vadd.f32 1e-06, %v222_v27 }
  0xd0   : > { %419 = vrcp.f32 %v223_v28  ;;  %v236_v32 = vand.u32 2147483648, %v223_v28  ;;  %v234_v34 = vand.u32 2147483647, %v223_v28  ;;  %vm230_vm4 = vweird.f32 %v223_v28 }
  0xd2   : > { %v237_v36 = vor.u32 1.1754944e-38, %v236_v32  ;;  %vm235_vm6 = vcmp.eq.f32.partialorder %v234_v34, 8.507059e+37 }
  0xd6   : > { %v420_v29 = vpop.eup %419 }
  0xd7   : > { %v226_v30 = vmul.f32 %v420_v29, %v223_v28  ;;  %vm231_vm3 = vweird.f32 %v420_v29 }
  0xd8   : > { %vm232_vm5 = vmor %vm230_vm4, %vm231_vm3 }
  0xd9   : > { %v227_v31 = vsub.f32 1.0, %v226_v30 }
  0xdb   : > { %v228_v33 = vmul.f32 %v420_v29, %v227_v31 }
  0xdd   : > { %v229_v35 = vadd.f32 %v420_v29, %v228_v33 }
  0xdf   : > { %v233_v37 = vsel %vm232_vm5, %v420_v29, %v229_v35 }
  0xe0   : > { %v238_v39 = vsel %vm235_vm6, %v237_v36, %v233_v37 }
  0xe1   : > { %v239_v40 = vmul.f32 %v238_v39, %v214_v18 }
  0xe3   : > { %v240_v41 = vmul.f32 %v239_v40, %v224_v38 }
  0xe5   : > { %v241_v42 = vadd.f32 1.0, %v240_v41 }
  0xe7   : > { %244 = vperm.xlu0 %415, %v241_v42  }
 0x159   : > { %v245_v47 = vpop.permute.xlu0 %244 }
 0x15a   : > { %v249_v48 = vperm.slane %v245_v47, %v248_v45 }
 0x15c   : > { %v251_v50 = vmul.f32 %v249_v48, %v637_v0 }
 0x15e   : > { %v262_v51 = vadd.f32 %v260_v49, %v251_v50 }
 0x160   : > { %263 = vst [vmem:[%s188_s11] sm:$0xff] %v262_v51 }
 0x161   : > { %478 = shalt.err (!%p475_p4)
}
 0x162   : > { %369 = dma.vmem_to_hbm [thread:$0]  (%p591_p11), %s279_s17, 128, %s281_s19, %s265_s16  }
 0x163 PF: > { %s292_s26 = sand.u32 1, %s505_s12   ;;  %p695_p7 = scmp.ge.s32.totalorder %s517_s15, 2 }
 0x164   : > { %s293_s4 = scalar_lea.sflag [#allocation4], %s292_s26 }
 0x165   : > { %p376_p5 = pnand %p695_p7, %p595_p12 }
 0x167   : > { %p377_p8 = pneg %p376_p5 }
 0x169   : > { %500 = dma.done.wait (%p377_p8), %s293_s4, 128  }
 0x16a   : > { %502 = vsyncadd (%p377_p8), %s293_s4, 4294967168  ;;  %p16_p10 = scmp.ge.s32.totalorder %s566_s18, 4   ;;  %s696_s12 = smov %s509_s13 }
 0x16b   : > { %s697_s13 = smov %s513_s14  ;;  %s698_s14 = smov %s578_s21 }
 0x16c   : > { %s699_s15 = smov %s566_s18  ;;  %18 = sbr.rel (!%p16_p10) target bundleno = 5 (0x5), region = 77 }
 0x171   :  { %299 = vsyncpa [#allocation3], 1 }
 0x172   :  { %301 = vsyncpa [#allocation3 + $0x1], 1 }
 0x173   :  { %302 = vsyncpa [#allocation4], 1 }
 0x174   :  { %304 = vsyncpa [#allocation4 + $0x1], 1 }

</bundles_post_ra>
